<compile_context>
chip_gen: v7x
topology: tpu7x:2x2x1
jax: 0.10.0
libtpu: 0.0.40
codegen_flags: <defaults>
</compile_context>

<pallas_src>
import jax
import jax.numpy as jnp
from jax import lax
from jax.experimental import pallas as pl

N_NODES      = 32   # nodes per mini-batch
IN_CHANNELS  = 16
HIDDEN       = 32
OUT_CHANNELS = 4
N_GRAPHS     = 2    # graphs per mini-batch (global_mean_pool groups)
N_BATCH      = 4    # mini-batches folded into one kernel step


def gcn_forward(x, adj, pool, params):
    """x: [B,N,C], adj: [B,N,N] (A+I, edge-weighted), pool: [B,G,N]."""
    B, N, C = x.shape
    G = pool.shape[1]
    H = params["w1"].shape[1]    # hidden size
    O = params["l2w"].shape[1]   # out feats
    BN, BG = B * N, B * G

    # ---- fold the batch into the matmul M dim via block-diagonal packing ----
    def block_diag(mats):  # [B, R, Cc] -> [B*R, B*Cc]
        b, r, c = mats.shape
        eye = jnp.eye(b, dtype=mats.dtype)
        return jnp.einsum("ab,aij->aibj", eye, mats).reshape(b * r, b * c)

    adj_bd = block_diag(adj)                              # [BN, BN] f32
    deg = jnp.sum(adj_bd, axis=1, keepdims=True)          # incoming degree (>=1: self-loops)
    dinv = lax.rsqrt(deg)                                 # [BN, 1]
    adj_hat = (dinv * adj_bd * dinv.T).astype(jnp.bfloat16)   # pre-normalized, bf16

    pool_bd = block_diag(pool).astype(jnp.bfloat16)       # [BG, BN]
    x_flat = x.reshape(BN, C).astype(jnp.bfloat16)        # [BN, C]

    # ---- pack the 8 weight/bias arrays into two zero-padded slabs ----
    def pad_to(a, rows, cols):
        return jnp.pad(a, ((0, rows - a.shape[0]), (0, cols - a.shape[1])))

    wslab = jnp.concatenate([
        pad_to(params["w1"],  C, H),   # rows [0, C)
        pad_to(params["w2"],  H, H),   # rows [C, C+H)
        pad_to(params["l1w"], H, H),   # rows [C+H, C+2H)   cols C..H-1 zero
        pad_to(params["l2w"], H, H),   # rows [C+2H, C+3H)  rows C.. / cols O.. zero
    ], axis=0).astype(jnp.bfloat16)    # [C+3H, H] = [112, 32]

    bslab = jnp.concatenate([
        pad_to(params["b1"],  1, H),
        pad_to(params["b2"],  1, H),
        pad_to(params["l1b"], 1, H),
        pad_to(params["l2b"], 1, H),
    ], axis=0).astype(jnp.float32)     # [4, H]

    o0, o1, o2, o3 = 0, C, C + H, C + 2 * H   # static slab row offsets (multiples of 16)

    def kernel(x_ref, adj_ref, pool_ref, w_ref, b_ref, out_ref):
        bf16 = jnp.bfloat16
        adj_n = adj_ref[...]   # [BN, BN] bf16, D^-1/2 (A+I) D^-1/2 (block-diagonal)

        def gcn_conv(h, w, b):
            hw  = jnp.dot(h, w, preferred_element_type=jnp.float32)             # [BN, H]
            agg = jnp.dot(adj_n, hw.astype(bf16), preferred_element_type=jnp.float32)
            return jnp.maximum(agg + b, 0.0)          # bias + ReLU epilogue in f32

        h1 = gcn_conv(x_ref[...],      w_ref[o0:o0 + C, :], b_ref[0:1, :])       # [BN, H]
        h2 = gcn_conv(h1.astype(bf16), w_ref[o1:o1 + H, :], b_ref[1:2, :])       # [BN, H]

        # global_mean_pool as one block-diagonal matmul
        g = jnp.dot(pool_ref[...], h2.astype(bf16), preferred_element_type=jnp.float32)  # [BG, H]

        # F.dropout(p=0.3) is identity at inference (training=False).
        g = jnp.maximum(
            jnp.dot(g.astype(bf16), w_ref[o2:o2 + H, :],
                    preferred_element_type=jnp.float32) + b_ref[2:3, :], 0.0)    # [BG, H]
        out_ref[...] = (jnp.dot(g.astype(bf16), w_ref[o3:o3 + H, :],
                                preferred_element_type=jnp.float32)
                        + b_ref[3:4, :])                                         # [BG, H] (cols O.. are 0)

    out_pad = pl.pallas_call(
        kernel,
        out_shape=jax.ShapeDtypeStruct((BG, H), jnp.float32),
    )(x_flat, adj_hat, pool_bd, wslab, bslab)

    return out_pad[:, :O].reshape(B, G, O)


def gcn_reference(x, adj, pool, params):
    """Pure-JAX f32 reference (same math, per mini-batch) for correctness."""
    deg = jnp.sum(adj, axis=-1, keepdims=True)
    dinv = lax.rsqrt(deg)

    def conv(h, w, b):
        hw = jnp.matmul(h, w)
        return dinv * jnp.matmul(adj, dinv * hw) + b

    h1 = jnp.maximum(conv(x,  params["w1"], params["b1"]), 0.0)
    h2 = jnp.maximum(conv(h1, params["w2"], params["b2"]), 0.0)
    g = jnp.matmul(pool, h2)
    g = jnp.maximum(jnp.matmul(g, params["l1w"]) + params["l1b"], 0.0)
    return jnp.matmul(g, params["l2w"]) + params["l2b"]


def _init_params(key):
    ks = jax.random.split(key, 4)
    s = 0.1
    return {
        # stored transposed vs torch so the kernel does y = x @ W + b
        "w1":  s * jax.random.normal(ks[0], (IN_CHANNELS, HIDDEN), jnp.float32),
        "b1":  jnp.zeros((1, HIDDEN), jnp.float32),
        "w2":  s * jax.random.normal(ks[1], (HIDDEN, HIDDEN), jnp.float32),
        "b2":  jnp.zeros((1, HIDDEN), jnp.float32),
        "l1w": s * jax.random.normal(ks[2], (HIDDEN, IN_CHANNELS), jnp.float32),
        "l1b": jnp.zeros((1, IN_CHANNELS), jnp.float32),
        "l2w": s * jax.random.normal(ks[3], (IN_CHANNELS, OUT_CHANNELS), jnp.float32),
        "l2b": jnp.zeros((1, OUT_CHANNELS), jnp.float32),
    }


if __name__ == "__main__":
    key = jax.random.PRNGKey(0)
    k_x, k_w, k_p = jax.random.split(key, 3)

    # node features
    x = jax.random.normal(k_x, (N_BATCH, N_NODES, IN_CHANNELS), jnp.float32)

    # deterministic edge_index: bidirectional ring inside each graph
    nodes_per_graph = N_NODES // N_GRAPHS
    src, dst = [], []
    for g in range(N_GRAPHS):
        base = g * nodes_per_graph
        for i in range(nodes_per_graph):
            a, b = base + i, base + (i + 1) % nodes_per_graph
            src += [a, b]
            dst += [b, a]
    src = jnp.array(src, jnp.int32)
    dst = jnp.array(dst, jnp.int32)
    n_edges = src.shape[0]

    # data.edge_attr -> positive per-edge weights (different per mini-batch)
    edge_w = 0.5 + jax.random.uniform(k_w, (N_BATCH, n_edges), jnp.float32)

    # dense weighted adjacency adj[b, dst, src] = w, plus self-loops weight 1.
    # Note: .at[].set drops duplicate edges (PyG would sum them) — harness only.
    adj = jnp.zeros((N_BATCH, N_NODES, N_NODES), jnp.float32)
    adj = adj.at[:, dst, src].set(edge_w)
    adj = adj + jnp.eye(N_NODES, dtype=jnp.float32)[None]

    # data.batch -> dense mean-pool matrix, same grouping in every mini-batch
    batch_vec = jnp.repeat(jnp.arange(N_GRAPHS), nodes_per_graph)          # [N]
    onehot = (batch_vec[None, :] == jnp.arange(N_GRAPHS)[:, None]).astype(jnp.float32)
    pool1 = onehot / jnp.sum(onehot, axis=1, keepdims=True)                # [G, N]
    pool = jnp.tile(pool1[None], (N_BATCH, 1, 1))                          # [B, G, N]

    params = _init_params(k_p)

    gcn = jax.jit(gcn_forward)
    out = gcn(x, adj, pool, params)
    jax.block_until_ready(out)
    assert out.shape == (N_BATCH, N_GRAPHS, OUT_CHANNELS)

    ref = gcn_reference(x, adj, pool, params)
    # bf16 matmul operands -> loose tolerance vs f32 reference
    assert jnp.allclose(out, ref, atol=2e-2, rtol=2e-2), "mismatch vs JAX reference"

    print("KERNEL_OK")
</pallas_src>

<mosaic_0001>
module attributes {stable_mosaic.version = 11 : i64} {
  func.func @kernel(%arg0: memref<128x16xbf16, #tpu.memory_space<vmem>>, %arg1: memref<128x128xbf16, #tpu.memory_space<vmem>>, %arg2: memref<8x128xbf16, #tpu.memory_space<vmem>>, %arg3: memref<112x32xbf16, #tpu.memory_space<vmem>>, %arg4: memref<4x32xf32, #tpu.memory_space<vmem>>, %arg5: memref<8x32xf32, #tpu.memory_space<vmem>>) attributes {dimension_semantics = [], scalar_prefetch = 0 : i64, scratch_operands = 0 : i64, tpu.core_type = #tpu.core_type<tc>} {
    %c0 = arith.constant 0 : index
    %c0_0 = arith.constant 0 : index
    %0 = vector.load %arg1[%c0, %c0_0] : memref<128x128xbf16, #tpu.memory_space<vmem>>, vector<128x128xbf16>
    %c0_1 = arith.constant 0 : index
    %c0_2 = arith.constant 0 : index
    %1 = vector.load %arg0[%c0_1, %c0_2] : memref<128x16xbf16, #tpu.memory_space<vmem>>, vector<128x16xbf16>
    %c0_3 = arith.constant 0 : index
    %c0_4 = arith.constant 0 : index
    %2 = vector.load %arg3[%c0_3, %c0_4] : memref<112x32xbf16, #tpu.memory_space<vmem>>, vector<16x32xbf16>
    %c0_5 = arith.constant 0 : index
    %c0_6 = arith.constant 0 : index
    %3 = vector.load %arg4[%c0_5, %c0_6] : memref<4x32xf32, #tpu.memory_space<vmem>>, vector<1x32xf32>
    %cst = arith.constant dense<0.000000e+00> : vector<128x32xf32>
    %4 = tpu.matmul %1, %2, %cst {dimension_numbers = #tpu.dot_dimension_numbers<[1], [0], [0], [1], [0, 0, 1, 1], [], []>} : vector<128x16xbf16>, vector<16x32xbf16>, vector<128x32xf32> -> vector<128x32xf32>
    %5 = arith.truncf %4 : vector<128x32xf32> to vector<128x32xbf16>
    %cst_7 = arith.constant dense<0.000000e+00> : vector<128x32xf32>
    %6 = tpu.matmul %0, %5, %cst_7 {dimension_numbers = #tpu.dot_dimension_numbers<[1], [0], [0], [1], [0, 0, 1, 1], [], []>} : vector<128x128xbf16>, vector<128x32xbf16>, vector<128x32xf32> -> vector<128x32xf32>
    %7 = vector.broadcast %3 : vector<1x32xf32> to vector<128x32xf32>
    %8 = arith.addf %6, %7 : vector<128x32xf32>
    %cst_8 = arith.constant 0.000000e+00 : f32
    %9 = vector.broadcast %cst_8 : f32 to vector<128x32xf32>
    %10 = arith.maximumf %8, %9 : vector<128x32xf32>
    %11 = arith.truncf %10 : vector<128x32xf32> to vector<128x32xbf16>
    %c16 = arith.constant 16 : index
    %c0_9 = arith.constant 0 : index
    %12 = vector.load %arg3[%c16, %c0_9] : memref<112x32xbf16, #tpu.memory_space<vmem>>, vector<32x32xbf16>
    %c1 = arith.constant 1 : index
    %c0_10 = arith.constant 0 : index
    %13 = vector.load %arg4[%c1, %c0_10] : memref<4x32xf32, #tpu.memory_space<vmem>>, vector<1x32xf32>
    %cst_11 = arith.constant dense<0.000000e+00> : vector<128x32xf32>
    %14 = tpu.matmul %11, %12, %cst_11 {dimension_numbers = #tpu.dot_dimension_numbers<[1], [0], [0], [1], [0, 0, 1, 1], [], []>} : vector<128x32xbf16>, vector<32x32xbf16>, vector<128x32xf32> -> vector<128x32xf32>
    %15 = arith.truncf %14 : vector<128x32xf32> to vector<128x32xbf16>
    %cst_12 = arith.constant dense<0.000000e+00> : vector<128x32xf32>
    %16 = tpu.matmul %0, %15, %cst_12 {dimension_numbers = #tpu.dot_dimension_numbers<[1], [0], [0], [1], [0, 0, 1, 1], [], []>} : vector<128x128xbf16>, vector<128x32xbf16>, vector<128x32xf32> -> vector<128x32xf32>
    %17 = vector.broadcast %13 : vector<1x32xf32> to vector<128x32xf32>
    %18 = arith.addf %16, %17 : vector<128x32xf32>
    %cst_13 = arith.constant 0.000000e+00 : f32
    %19 = vector.broadcast %cst_13 : f32 to vector<128x32xf32>
    %20 = arith.maximumf %18, %19 : vector<128x32xf32>
    %c0_14 = arith.constant 0 : index
    %c0_15 = arith.constant 0 : index
    %21 = vector.load %arg2[%c0_14, %c0_15] : memref<8x128xbf16, #tpu.memory_space<vmem>>, vector<8x128xbf16>
    %22 = arith.truncf %20 : vector<128x32xf32> to vector<128x32xbf16>
    %cst_16 = arith.constant dense<0.000000e+00> : vector<8x32xf32>
    %23 = tpu.matmul %21, %22, %cst_16 {dimension_numbers = #tpu.dot_dimension_numbers<[1], [0], [0], [1], [0, 0, 1, 1], [], []>} : vector<8x128xbf16>, vector<128x32xbf16>, vector<8x32xf32> -> vector<8x32xf32>
    %24 = arith.truncf %23 : vector<8x32xf32> to vector<8x32xbf16>
    %c48 = arith.constant 48 : index
    %c0_17 = arith.constant 0 : index
    %25 = vector.load %arg3[%c48, %c0_17] : memref<112x32xbf16, #tpu.memory_space<vmem>>, vector<32x32xbf16>
    %cst_18 = arith.constant dense<0.000000e+00> : vector<8x32xf32>
    %26 = tpu.matmul %24, %25, %cst_18 {dimension_numbers = #tpu.dot_dimension_numbers<[1], [0], [0], [1], [0, 0, 1, 1], [], []>} : vector<8x32xbf16>, vector<32x32xbf16>, vector<8x32xf32> -> vector<8x32xf32>
    %c2 = arith.constant 2 : index
    %c0_19 = arith.constant 0 : index
    %27 = vector.load %arg4[%c2, %c0_19] : memref<4x32xf32, #tpu.memory_space<vmem>>, vector<1x32xf32>
    %28 = vector.broadcast %27 : vector<1x32xf32> to vector<8x32xf32>
    %29 = arith.addf %26, %28 : vector<8x32xf32>
    %cst_20 = arith.constant 0.000000e+00 : f32
    %30 = vector.broadcast %cst_20 : f32 to vector<8x32xf32>
    %31 = arith.maximumf %29, %30 : vector<8x32xf32>
    %32 = arith.truncf %31 : vector<8x32xf32> to vector<8x32xbf16>
    %c80 = arith.constant 80 : index
    %c0_21 = arith.constant 0 : index
    %33 = vector.load %arg3[%c80, %c0_21] : memref<112x32xbf16, #tpu.memory_space<vmem>>, vector<32x32xbf16>
    %cst_22 = arith.constant dense<0.000000e+00> : vector<8x32xf32>
    %34 = tpu.matmul %32, %33, %cst_22 {dimension_numbers = #tpu.dot_dimension_numbers<[1], [0], [0], [1], [0, 0, 1, 1], [], []>} : vector<8x32xbf16>, vector<32x32xbf16>, vector<8x32xf32> -> vector<8x32xf32>
    %c3 = arith.constant 3 : index
    %c0_23 = arith.constant 0 : index
    %35 = vector.load %arg4[%c3, %c0_23] : memref<4x32xf32, #tpu.memory_space<vmem>>, vector<1x32xf32>
    %36 = vector.broadcast %35 : vector<1x32xf32> to vector<8x32xf32>
    %37 = arith.addf %34, %36 : vector<8x32xf32>
    %c0_24 = arith.constant 0 : index
    %c0_25 = arith.constant 0 : index
    %38 = vector.load %arg5[%c0_24, %c0_25] : memref<8x32xf32, #tpu.memory_space<vmem>>, vector<8x32xf32>
    tpu.vector_store %arg5[%c0_24, %c0_25], %37 {strides = array<i32>} : memref<8x32xf32, #tpu.memory_space<vmem>>, vector<8x32xf32>,
    return
  }
}

</mosaic_0001>

<bundles_post_ra>
// kernel: gcn_forward.1
= control target key start
LH: loop header
LB: loop body
LE: loop exit
PB: predicated region body
PF: predicated region fallthrough
CT: control target
= control target key end

     0   :  { %vm103_vm0 = vcmask 130048   ;;  %s1358_s0 = inlined_call_operand.vmem [shape: bf16[128,16], index: 0, kind: input, shape index: {}]   ;;  %s1359_s1 = inlined_call_operand.vmem [shape: bf16[128,128], index: 1, kind: input, shape index: {}]   ;;  %s1360_s2 = inlined_call_operand.vmem [shape: bf16[8,128], index: 2, kind: input, shape index: {}]   ;;  %s1361_s3 = inlined_call_operand.vmem [shape: bf16[112,32], index: 3, kind: input, shape index: {}]   ;;  %s1362_s4 = inlined_call_operand.vmem [shape: f32[4,32], index: 4, kind: input, shape index: {}]   ;;  %s1363_s5 = inlined_call_operand.hbm [shape: f32[8,32], index: 5, kind: output, shape index: {}]  }
   0x1   :  { %v1117_v0 = vld [vmem:[%s1361_s3] sm:$0xff]   ;;  %v1119_v2 = vld [vmem:[%s1358_s0 + $0x8] sm:$0xff]   ;;  %v1120_v3 = vld [vmem:[%s1358_s0 + $0x10] sm:$0xff]  }
   0x2   :  { %v1118_v1 = vld [vmem:[%s1358_s0] sm:$0xff]   ;;  %976 = vmatprep.subr.bf16.mxu0 %v1117_v0  ;;  %v1121_v4 = vld [vmem:[%s1358_s0 + $0x18] sm:$0xff]   ;;  %v1123_v6 = vld [vmem:[%s1358_s0 + $0x28] sm:$0xff]  }
   0x3   :  { %977 = vmatpush3.bf16.msra.mxu0 %v1117_v0  ;;  %978 = vmatprep.mubr.msk.bf16.mxu0 %vm103_vm0, %v1118_v1  ;;  %v1122_v5 = vld [vmem:[%s1358_s0 + $0x20] sm:$0xff]  }
   0x6   :  { %979 = vmatmul.mubr.msk.bf16.vlgmr.msra.gmra.mrb[0].mxu0 %vm103_vm0, %v1119_v2 }
   0x7   :  { %982 = vmatprep.mubr.msk.bf16.mxu0 %vm103_vm0, %v1120_v3 }
   0xe   :  { %983 = vmatmul.mubr.msk.bf16.gmra.mrb[4].mxu0 %vm103_vm0, %v1121_v4 }
   0xf   :  { %986 = vmatprep.mubr.msk.bf16.mxu0 %vm103_vm0, %v1122_v5 }
  0x10   :  { %10 = vsyncpa [#allocation3], 0  ;;  %v1124_v7 = vld [vmem:[%s1358_s0 + $0x30] sm:$0xff]   ;;  %v1125_v8 = vld [vmem:[%s1358_s0 + $0x38] sm:$0xff]   ;;  %vm423_vm1 = vcmask 261120   ;;  %vm1165_vm2 = vmmov 0  }
  0x11   :  { %v1126_v9 = vld [vmem:[%s1359_s1] sm:$0xff]   ;;  %v1134_v10 = vld [vmem:[%s1361_s3 + $0x8] sm:$0xff]   ;;  %v1135_v11 = vld [vmem:[%s1361_s3 + $0x10] sm:$0xff]   ;;  %s1166_s20 = smov [#allocation2]  }
  0x12   :  { %1010 = vmatprep.mubr.bf16.mxu1 %v1126_v9  ;;  %1026 = vmatprep.subr.bf16.mxu0 %v1134_v10  ;;  %v1244_v36 = vld [vmem:[%s1359_s1 + $0x8] sm:$0xff]   ;;  %v1249_v37 = vld [vmem:[%s1359_s1 + $0x10] sm:$0xff]   ;;  %v1256_v38 = vld [vmem:[%s1359_s1 + $0x18] sm:$0xff]  }
  0x13   :  { %1027 = vmatpush3.bf16.msra.mxu0 %v1134_v10  ;;  %v1261_v39 = vld [vmem:[%s1359_s1 + $0x20] sm:$0xff]   ;;  %v1268_v40 = vld [vmem:[%s1359_s1 + $0x28] sm:$0xff]   ;;  %v1273_v41 = vld [vmem:[%s1359_s1 + $0x30] sm:$0xff]  }
  0x14   :  { %1028 = vmatprep.subr.bf16.mxu0 %v1135_v11  ;;  %v1280_v42 = vld [vmem:[%s1359_s1 + $0x38] sm:$0xff]   ;;  %v882_v43 = vld [vmem:[%s1362_s4] ss:$0 sm:$0xff] }
  0x16   :  { %987 = vmatmul.mubr.msk.bf16.gmra.mrb[8].mxu0 %vm103_vm0, %v1123_v6 }
  0x17   :  { %990 = vmatprep.mubr.msk.bf16.mxu0 %vm103_vm0, %v1124_v7  ;;  %1029 = vmatpush3.bf16.msra.mxu0 %v1135_v11 }
  0x1e   :  { %991 = vmatmul.mubr.msk.bf16.gmra.mrb[12].mxu0 %vm103_vm0, %v1125_v8 }
  0xd9   :  { %v980_v12 = vpop.f32.mrb[0].mxu0 }
  0xda   :  { %v162_v13 = vpop.f32.mrb[1].mxu0 }
  0xdb   :  { %v981_v14 = vpop.f32.mrb[2].mxu0 }
  0xdc   :  { %v226_v15 = vpack.c.bf16 %v981_v14, %v980_v12  ;;  %v165_v16 = vpop.f32.mrb[3].mxu0 }
  0xdd   :  { %v225_v17 = vpack.c.bf16 %v165_v16, %v162_v13 }
  0xdf   :  { %994 = vmatprep.subr.bf16.mxu1 %v225_v17 }
  0xe0   :  { %995 = vmatpush3.bf16.msra.mxu1 %v225_v17 }
  0xe1   :  { %v984_v18 = vpop.f32.mrb[4].mxu0  ;;  %996 = vmatprep.subr.bf16.mxu1 %v226_v15 }
  0xe2   :  { %v178_v19 = vpop.f32.mrb[5].mxu0 }
  0xe3   :  { %v985_v20 = vpop.f32.mrb[6].mxu0 }
  0xe4   :  { %v228_v21 = vpack.c.bf16 %v985_v20, %v984_v18  ;;  %v181_v22 = vpop.f32.mrb[7].mxu0  ;;  %997 = vmatpush3.bf16.msra.mxu1 %v226_v15 }
  0xe5   :  { %v227_v23 = vpack.c.bf16 %v181_v22, %v178_v19 }
  0xe7   :  { %998 = vmatprep.subr.bf16.mxu1 %v227_v23 }
  0xe8   :  { %999 = vmatpush3.bf16.msra.mxu1 %v227_v23 }
  0xe9   :  { %v988_v24 = vpop.f32.mrb[8].mxu0  ;;  %1000 = vmatprep.subr.bf16.mxu1 %v228_v21 }
  0xea   :  { %v194_v25 = vpop.f32.mrb[9].mxu0 }
  0xeb   :  { %v989_v26 = vpop.f32.mrb[10].mxu0 }
  0xec   :  { %v230_v27 = vpack.c.bf16 %v989_v26, %v988_v24  ;;  %v197_v28 = vpop.f32.mrb[11].mxu0  ;;  %1001 = vmatpush3.bf16.msra.mxu1 %v228_v21 }
  0xed   :  { %v229_v29 = vpack.c.bf16 %v197_v28, %v194_v25 }
  0xef   :  { %1002 = vmatprep.subr.bf16.mxu1 %v229_v29 }
  0xf0   :  { %1003 = vmatpush3.bf16.msra.mxu1 %v229_v29 }
  0xf1   :  { %v992_v30 = vpop.f32.mrb[12].mxu0  ;;  %1004 = vmatprep.subr.bf16.mxu1 %v230_v27 }
  0xf2   :  { %v210_v31 = vpop.f32.mrb[13].mxu0 }
  0xf3   :  { %v993_v32 = vpop.f32.mrb[14].mxu0 }
  0xf4   :  { %v232_v33 = vpack.c.bf16 %v993_v32, %v992_v30  ;;  %v213_v34 = vpop.f32.mrb[15].mxu0  ;;  %1005 = vmatpush3.bf16.msra.mxu1 %v230_v27 }
  0xf5   :  { %v231_v35 = vpack.c.bf16 %v213_v34, %v210_v31 }
  0xf7   :  { %1006 = vmatprep.subr.bf16.mxu1 %v231_v35 }
  0xf8   :  { %1007 = vmatpush3.bf16.msra.mxu1 %v231_v35 }
  0xf9   :  { %1008 = vmatprep.subr.bf16.mxu1 %v232_v33 }
  0xfc   :  { %1009 = vmatpush3.bf16.msra.mxu1 %v232_v33 }
  0xff   :  { %1011 = vmatmul.mubr.bf16.vlgmr.msra.gmra.mrb[0].mxu1 %v1244_v36 }
 0x100   :  { %1014 = vmatprep.mubr.bf16.mxu1 %v1249_v37 }
 0x107   :  { %1015 = vmatmul.mubr.bf16.gmra.mrb[4].mxu1 %v1256_v38 }
 0x108   :  { %1018 = vmatprep.mubr.bf16.mxu1 %v1261_v39 }
 0x10f   :  { %1019 = vmatmul.mubr.bf16.gmra.mrb[8].mxu1 %v1268_v40 }
 0x110   :  { %1022 = vmatprep.mubr.bf16.mxu1 %v1273_v41 }
 0x117   :  { %1023 = vmatmul.mubr.bf16.gmra.mrb[12].mxu1 %v1280_v42 }
 0x118   :  { %1062 = vmatprep.mubr.bf16.mxu1 %v1126_v9 }
 0x1d2   :  { %v1012_v44 = vpop.f32.mrb[0].mxu1 }
 0x1d3   :  { %v328_v45 = vadd.f32 %v1012_v44, %v882_v43  ;;  %v319_v46 = vpop.f32.mrb[1].mxu1 }
 0x1d4   :  { %v320_v47 = vadd.f32 %v882_v43, %v319_v46  ;;  %v1013_v48 = vpop.f32.mrb[2].mxu1 }
 0x1d5   :  { %v331_v49 = vadd.f32 %v1013_v48, %v882_v43  ;;  %v322_v50 = vpop.f32.mrb[3].mxu1  ;;  %v384_v52 = vmax.f32 %v328_v45, 0.0 }
 0x1d6   :  { %v323_v51 = vadd.f32 %v882_v43, %v322_v50  ;;  %v382_v54 = vmax.f32 %v320_v47, 0.0 }
 0x1d7   :  { %v385_v53 = vmax.f32 %v331_v49, 0.0 }
 0x1d8   :  { %v383_v55 = vmax.f32 %v323_v51, 0.0 }
 0x1d9   :  { %v399_v56 = vpack.c.bf16 %v385_v53, %v384_v52 }
 0x1da   :  { %v398_v57 = vpack.c.bf16 %v383_v55, %v382_v54  ;;  %v1016_v58 = vpop.f32.mrb[4].mxu1 }
 0x1db   :  { %v344_v59 = vadd.f32 %v1016_v58, %v882_v43  ;;  %v335_v60 = vpop.f32.mrb[5].mxu1 }
 0x1dc   :  { %v336_v61 = vadd.f32 %v882_v43, %v335_v60  ;;  %v1017_v62 = vpop.f32.mrb[6].mxu1  ;;  %1030 = vmatprep.mubr.msk.bf16.mxu0 %vm423_vm1, %v398_v57 }
 0x1dd   :  { %v347_v63 = vadd.f32 %v1017_v62, %v882_v43  ;;  %v338_v0 = vpop.f32.mrb[7].mxu1  ;;  %1031 = vmatmul.mubr.msk.bf16.vlgmr.msra.gmra.mrb[16].mxu0 %vm423_vm1, %v399_v56  ;;  %v388_v2 = vmax.f32 %v344_v59, 0.0 }
 0x1de   :  { %v339_v1 = vadd.f32 %v882_v43, %v338_v0  ;;  %v386_v4 = vmax.f32 %v336_v61, 0.0 }
 0x1df   :  { %v389_v3 = vmax.f32 %v347_v63, 0.0 }
 0x1e0   :  { %v387_v5 = vmax.f32 %v339_v1, 0.0 }
 0x1e1   :  { %v401_v6 = vpack.c.bf16 %v389_v3, %v388_v2  ;;  %v1164_v3 = vmov 0.0  }
 0x1e2   :  { %v400_v7 = vpack.c.bf16 %v387_v5, %v386_v4  ;;  %v1020_v8 = vpop.f32.mrb[8].mxu1  ;;  %1078 = vmatprep.subr.bf16.mxu0 %v1164_v3 }
 0x1e3   :  { %v360_v9 = vadd.f32 %v1020_v8, %v882_v43  ;;  %v351_v10 = vpop.f32.mrb[9].mxu1 }
 0x1e4   :  { %v352_v11 = vadd.f32 %v882_v43, %v351_v10  ;;  %v1021_v12 = vpop.f32.mrb[10].mxu1  ;;  %1034 = vmatprep.mubr.msk.bf16.mxu0 %vm423_vm1, %v400_v7 }
 0x1e5   :  { %v363_v13 = vadd.f32 %v1021_v12, %v882_v43  ;;  %v354_v14 = vpop.f32.mrb[11].mxu1  ;;  %1035 = vmatmul.mubr.msk.bf16.gmra.mrb[20].mxu0 %vm423_vm1, %v401_v6  ;;  %v392_v16 = vmax.f32 %v360_v9, 0.0 }
 0x1e6   :  { %v355_v15 = vadd.f32 %v882_v43, %v354_v14  ;;  %v390_v18 = vmax.f32 %v352_v11, 0.0 }
 0x1e7   :  { %v393_v17 = vmax.f32 %v363_v13, 0.0 }
 0x1e8   :  { %v391_v19 = vmax.f32 %v355_v15, 0.0 }
 0x1e9   :  { %v403_v20 = vpack.c.bf16 %v393_v17, %v392_v16 }
 0x1ea   :  { %v402_v21 = vpack.c.bf16 %v391_v19, %v390_v18  ;;  %v1024_v22 = vpop.f32.mrb[12].mxu1 }
 0x1eb   :  { %v376_v23 = vadd.f32 %v1024_v22, %v882_v43  ;;  %v367_v24 = vpop.f32.mrb[13].mxu1 }
 0x1ec   :  { %v368_v25 = vadd.f32 %v882_v43, %v367_v24  ;;  %v1025_v26 = vpop.f32.mrb[14].mxu1  ;;  %1038 = vmatprep.mubr.msk.bf16.mxu0 %vm423_vm1, %v402_v21 }
 0x1ed   :  { %v379_v27 = vadd.f32 %v1025_v26, %v882_v43  ;;  %v370_v28 = vpop.f32.mrb[15].mxu1  ;;  %1039 = vmatmul.mubr.msk.bf16.gmra.mrb[24].mxu0 %vm423_vm1, %v403_v20  ;;  %v396_v30 = vmax.f32 %v376_v23, 0.0 }
 0x1ee   :  { %v371_v29 = vadd.f32 %v882_v43, %v370_v28  ;;  %v394_v32 = vmax.f32 %v368_v25, 0.0 }
 0x1ef   :  { %v397_v31 = vmax.f32 %v379_v27, 0.0 }
 0x1f0   :  { %v395_v33 = vmax.f32 %v371_v29, 0.0 }
 0x1f1   :  { %v405_v34 = vpack.c.bf16 %v397_v31, %v396_v30 }
 0x1f2   :  { %v404_v35 = vpack.c.bf16 %v395_v33, %v394_v32 }
 0x1f4   :  { %1042 = vmatprep.mubr.msk.bf16.mxu0 %vm423_vm1, %v404_v35 }
 0x1f5   :  { %1043 = vmatmul.mubr.msk.bf16.gmra.mrb[28].mxu0 %vm423_vm1, %v405_v34 }
 0x1f6   :  { %1094 = vmatprep.mubr.msk.bf16.mxu0 %vm1165_vm2, %v1164_v3 }
 0x2b0   :  { %v1032_v44 = vpop.f32.mrb[16].mxu0 }
 0x2b1   :  { %v482_v45 = vpop.f32.mrb[17].mxu0 }
 0x2b2   :  { %v1033_v46 = vpop.f32.mrb[18].mxu0 }
 0x2b3   :  { %v546_v47 = vpack.c.bf16 %v1033_v46, %v1032_v44  ;;  %v485_v48 = vpop.f32.mrb[19].mxu0 }
 0x2b4   :  { %v545_v49 = vpack.c.bf16 %v485_v48, %v482_v45 }
 0x2b6   :  { %1046 = vmatprep.subr.bf16.mxu1 %v545_v49 }
 0x2b7   :  { %1047 = vmatpush3.bf16.msra.mxu1 %v545_v49 }
 0x2b8   :  { %v1036_v50 = vpop.f32.mrb[20].mxu0  ;;  %1048 = vmatprep.subr.bf16.mxu1 %v546_v47 }
 0x2b9   :  { %v498_v43 = vpop.f32.mrb[21].mxu0 }
 0x2ba   :  { %v1037_v51 = vpop.f32.mrb[22].mxu0 }
 0x2bb   :  { %v548_v52 = vpack.c.bf16 %v1037_v51, %v1036_v50  ;;  %v501_v53 = vpop.f32.mrb[23].mxu0  ;;  %1049 = vmatpush3.bf16.msra.mxu1 %v546_v47 }
 0x2bc   :  { %v547_v54 = vpack.c.bf16 %v501_v53, %v498_v43 }
 0x2be   :  { %1050 = vmatprep.subr.bf16.mxu1 %v547_v54 }
 0x2bf   :  { %1051 = vmatpush3.bf16.msra.mxu1 %v547_v54 }
 0x2c0   :  { %v1040_v55 = vpop.f32.mrb[24].mxu0  ;;  %1052 = vmatprep.subr.bf16.mxu1 %v548_v52 }
 0x2c1   :  { %v514_v56 = vpop.f32.mrb[25].mxu0 }
 0x2c2   :  { %v1041_v57 = vpop.f32.mrb[26].mxu0 }
 0x2c3   :  { %v550_v58 = vpack.c.bf16 %v1041_v57, %v1040_v55  ;;  %v517_v59 = vpop.f32.mrb[27].mxu0  ;;  %1053 = vmatpush3.bf16.msra.mxu1 %v548_v52 }
 0x2c4   :  { %v549_v60 = vpack.c.bf16 %v517_v59, %v514_v56 }
 0x2c6   :  { %1054 = vmatprep.subr.bf16.mxu1 %v549_v60 }
 0x2c7   :  { %1055 = vmatpush3.bf16.msra.mxu1 %v549_v60 }
 0x2c8   :  { %v1044_v61 = vpop.f32.mrb[28].mxu0  ;;  %1056 = vmatprep.subr.bf16.mxu1 %v550_v58 }
 0x2c9   :  { %v530_v62 = vpop.f32.mrb[29].mxu0 }
 0x2ca   :  { %v1045_v63 = vpop.f32.mrb[30].mxu0 }
 0x2cb   :  { %v552_v0 = vpack.c.bf16 %v1045_v63, %v1044_v61  ;;  %v533_v1 = vpop.f32.mrb[31].mxu0  ;;  %1057 = vmatpush3.bf16.msra.mxu1 %v550_v58  ;;  %v670_v61 = vld [vmem:[%s1360_s2] sm:$0xf] }
 0x2cc   :  { %v551_v2 = vpack.c.bf16 %v533_v1, %v530_v62  ;;  %v1136_v62 = vld [vmem:[%s1361_s3 + $0x18] sm:$0xff]   ;;  %v1137_v63 = vld [vmem:[%s1361_s3 + $0x20] sm:$0xff]  }
 0x2ce   :  { %1058 = vmatprep.subr.bf16.mxu1 %v551_v2 }
 0x2cf   :  { %1059 = vmatpush3.bf16.msra.mxu1 %v551_v2 }
 0x2d0   :  { %1060 = vmatprep.subr.bf16.mxu1 %v552_v0 }
 0x2d3   :  { %1061 = vmatpush3.bf16.msra.mxu1 %v552_v0 }
 0x2d6   :  { %1063 = vmatmul.mubr.bf16.vlgmr.msra.gmra.mrb[16].mxu1 %v1244_v36  ;;  %v901_v36 = vld [vmem:[%s1362_s4 + $0x1] ss:$0 sm:$0xff] }
 0x2d7   :  { %1066 = vmatprep.mubr.bf16.mxu1 %v1249_v37 }
 0x2de   :  { %1067 = vmatmul.mubr.bf16.gmra.mrb[20].mxu1 %v1256_v38 }
 0x2df   :  { %1070 = vmatprep.mubr.bf16.mxu1 %v1261_v39 }
 0x2e6   :  { %1071 = vmatmul.mubr.bf16.gmra.mrb[24].mxu1 %v1268_v40 }
 0x2e7   :  { %1074 = vmatprep.mubr.bf16.mxu1 %v1273_v41 }
 0x2ee   :  { %1075 = vmatmul.mubr.bf16.gmra.mrb[28].mxu1 %v1280_v42 }
 0x3a9   :  { %v1064_v37 = vpop.f32.mrb[16].mxu1 }
 0x3aa   :  { %v600_v38 = vadd.f32 %v1064_v37, %v901_v36  ;;  %v591_v39 = vpop.f32.mrb[17].mxu1 }
 0x3ab   :  { %v592_v4 = vadd.f32 %v901_v36, %v591_v39  ;;  %v1065_v40 = vpop.f32.mrb[18].mxu1  ;;  %v1139_v39 = vld [vmem:[%s1361_s3 + $0x30] sm:$0xff]  }
 0x3ac   :  { %v603_v5 = vadd.f32 %v1065_v40, %v901_v36  ;;  %v594_v41 = vpop.f32.mrb[19].mxu1  ;;  %v656_v42 = vmax.f32 %v600_v38, 0.0  ;;  %v1138_v38 = vld [vmem:[%s1361_s3 + $0x28] sm:$0xff]   ;;  %s857_s3 = sshll.u32 %s1166_s20, 4  ;;  %s858_s3 = int_to_ptr.vmem [resolvable:$true] %s857_s3 }
 0x3ad   :  { %v595_v6 = vadd.f32 %v901_v36, %v594_v41  ;;  %v654_v8 = vmax.f32 %v592_v4, 0.0  ;;  %v902_v4 = vld [vmem:[%s1362_s4 + $0x2] ss:$0 sm:$0xff]  ;;  %s1140_s21 = scalar_lea.vmem %s858_s3, 128  ;;  %p1145_p1 = scmp.lt.s32.totalorder %s858_s3, %s858_s3 }
 0x3ae   :  { %v657_v7 = vmax.f32 %v603_v5, 0.0  ;;  %p1141_p0 = scmp.ne.s32.totalorder %s858_s3, %s1140_s21  ;;  %p1146_p2 = scmp.lt.s32.totalorder %s1140_s21, %s1140_s21 }
 0x3af   :  { %v655_v9 = vmax.f32 %v595_v6, 0.0 }
 0x3b0   :  { %v672_v10 = vpack.c.bf16 %v657_v7, %v656_v42  ;;  %p1147_p3 = por %p1146_p2, %p1145_p1 }
 0x3b1   :  { %v671_v11 = vpack.c.bf16 %v655_v9, %v654_v8  ;;  %v1068_v12 = vpop.f32.mrb[20].mxu1 }
 0x3b2   :  { %v616_v13 = vadd.f32 %v1068_v12, %v901_v36  ;;  %v607_v14 = vpop.f32.mrb[21].mxu1  ;;  %p1148_p4 = pnand %p1147_p3, %p1141_p0 }
 0x3b3   :  { %v608_v15 = vadd.f32 %v901_v36, %v607_v14  ;;  %v1069_v16 = vpop.f32.mrb[22].mxu1  ;;  %1079 = vmatpush3.bf16.msra.mxu0 %v671_v11 }
 0x3b4   :  { %v619_v17 = vadd.f32 %v1069_v16, %v901_v36  ;;  %v610_v18 = vpop.f32.mrb[23].mxu1  ;;  %1080 = vmatprep.subr.bf16.mxu0 %v1164_v3  ;;  %v660_v20 = vmax.f32 %v616_v13, 0.0 }
 0x3b5   :  { %v611_v19 = vadd.f32 %v901_v36, %v610_v18  ;;  %v658_v22 = vmax.f32 %v608_v15, 0.0 }
 0x3b6   :  { %v661_v21 = vmax.f32 %v619_v17, 0.0 }
 0x3b7   :  { %v659_v23 = vmax.f32 %v611_v19, 0.0  ;;  %1081 = vmatpush3.bf16.msra.mxu0 %v672_v10 }
 0x3b8   :  { %v674_v24 = vpack.c.bf16 %v661_v21, %v660_v20  ;;  %1082 = vmatprep.subr.bf16.mxu0 %v1164_v3 }
 0x3b9   :  { %v673_v25 = vpack.c.bf16 %v659_v23, %v658_v22  ;;  %v1072_v26 = vpop.f32.mrb[24].mxu1 }
 0x3ba   :  { %v632_v27 = vadd.f32 %v1072_v26, %v901_v36  ;;  %v623_v28 = vpop.f32.mrb[25].mxu1 }
 0x3bb   :  { %v624_v29 = vadd.f32 %v901_v36, %v623_v28  ;;  %v1073_v30 = vpop.f32.mrb[26].mxu1  ;;  %1083 = vmatpush3.bf16.msra.mxu0 %v673_v25 }
 0x3bc   :  { %v635_v31 = vadd.f32 %v1073_v30, %v901_v36  ;;  %v626_v32 = vpop.f32.mrb[27].mxu1  ;;  %1084 = vmatprep.subr.bf16.mxu0 %v1164_v3  ;;  %v664_v34 = vmax.f32 %v632_v27, 0.0 }
 0x3bd   :  { %v627_v33 = vadd.f32 %v901_v36, %v626_v32  ;;  %v662_v44 = vmax.f32 %v624_v29, 0.0 }
 0x3be   :  { %v665_v35 = vmax.f32 %v635_v31, 0.0 }
 0x3bf   :  { %v663_v45 = vmax.f32 %v627_v33, 0.0  ;;  %1085 = vmatpush3.bf16.msra.mxu0 %v674_v24 }
 0x3c0   :  { %v676_v46 = vpack.c.bf16 %v665_v35, %v664_v34  ;;  %1086 = vmatprep.subr.bf16.mxu0 %v1164_v3 }
 0x3c1   :  { %v675_v47 = vpack.c.bf16 %v663_v45, %v662_v44  ;;  %v1076_v48 = vpop.f32.mrb[28].mxu1 }
 0x3c2   :  { %v648_v49 = vadd.f32 %v1076_v48, %v901_v36  ;;  %v639_v50 = vpop.f32.mrb[29].mxu1 }
 0x3c3   :  { %v640_v43 = vadd.f32 %v901_v36, %v639_v50  ;;  %v1077_v51 = vpop.f32.mrb[30].mxu1  ;;  %1087 = vmatpush3.bf16.msra.mxu0 %v675_v47 }
 0x3c4   :  { %v651_v52 = vadd.f32 %v1077_v51, %v901_v36  ;;  %v642_v53 = vpop.f32.mrb[31].mxu1  ;;  %1088 = vmatprep.subr.bf16.mxu0 %v1164_v3  ;;  %v668_v55 = vmax.f32 %v648_v49, 0.0 }
 0x3c5   :  { %v643_v54 = vadd.f32 %v901_v36, %v642_v53  ;;  %v666_v57 = vmax.f32 %v640_v43, 0.0 }
 0x3c6   :  { %v669_v56 = vmax.f32 %v651_v52, 0.0 }
 0x3c7   :  { %v667_v58 = vmax.f32 %v643_v54, 0.0  ;;  %1089 = vmatpush3.bf16.msra.mxu0 %v676_v46 }
 0x3c8   :  { %v678_v59 = vpack.c.bf16 %v669_v56, %v668_v55  ;;  %1090 = vmatprep.subr.bf16.mxu0 %v1164_v3 }
 0x3c9   :  { %v677_v60 = vpack.c.bf16 %v667_v58, %v666_v57 }
 0x3cb   :  { %1091 = vmatpush3.bf16.msra.mxu0 %v677_v60 }
 0x3cc   :  { %1092 = vmatprep.subr.bf16.mxu0 %v1164_v3 }
 0x3cf   :  { %1093 = vmatpush3.bf16.msra.mxu0 %v678_v59 }
 0x3d0   :  { %1098 = vmatprep.subr.bf16.mxu0 %v1164_v3 }
 0x3d2   :  { %1095 = vmatmul.mubr.bf16.vlgmr.msra.gmra.mrb[32].mxu0 %v670_v61 }
 0x3d3   :  { %1099 = vmatpush3.bf16.msra.mxu0 %v1136_v62  ;;  %1102 = vmatprep.mubr.msk.bf16.mxu0 %vm1165_vm2, %v1164_v3 }
 0x3d4   :  { %1100 = vmatprep.subr.bf16.mxu0 %v1164_v3 }
 0x3d7   :  { %1101 = vmatpush3.bf16.msra.mxu0 %v1137_v63 }
 0x3d8   :  { %1106 = vmatprep.subr.bf16.mxu0 %v1164_v3 }
 0x4a5   :  { %v713_v0 = vpop.f32.mrb[32].mxu0 }
 0x4a6   :  { %v719_v1 = vpack.c.bf16 %v713_v0, %v713_v0  ;;  %v1096_v2 = vpop.f32.mrb[33].mxu0 }
 0x4a7   :  { %v716_v36 = vpop.f32.mrb[34].mxu0 }
 0x4a8   :  { %v1097_v37 = vpop.f32.mrb[35].mxu0  ;;  %1103 = vmatmul.mubr.msk.bf16.vlgmr.msra.gmra.mrb[36].mxu0 %vm423_vm1, %v719_v1 }
 0x4a9   :  { %1110 = vmatprep.mubr.msk.bf16.mxu0 %vm1165_vm2, %v1164_v3  ;;  %1107 = vmatpush3.bf16.msra.mxu0 %v1138_v38 }
 0x4aa   :  { %1108 = vmatprep.subr.bf16.mxu0 %v1164_v3  ;;  %v906_v3 = vld [vmem:[%s1362_s4 + $0x3] ss:$0 sm:$0xff] }
 0x4ad   :  { %1109 = vmatpush3.bf16.msra.mxu0 %v1139_v39 }
 0x57b   :  { %v778_v40 = vpop.f32.mrb[36].mxu0 }
 0x57c   :  { %v779_v5 = vadd.f32 %v902_v4, %v778_v40  ;;  %v1104_v41 = vpop.f32.mrb[37].mxu0 }
 0x57d   :  { %v781_v6 = vpop.f32.mrb[38].mxu0 }
 0x57e   :  { %v784_v42 = vmax.f32 %v779_v5, 0.0  ;;  %v1105_v7 = vpop.f32.mrb[39].mxu0 }
 0x580   :  { %v785_v8 = vpack.c.bf16 %v784_v42, %v784_v42 }
 0x582   :  { %1111 = vmatmul.mubr.msk.bf16.vlgmr.msra.gmra.mrb[40].mxu0 %vm423_vm1, %v785_v8 }
 0x655   :  { %v844_v9 = vpop.f32.mrb[40].mxu0 }
 0x656   :  { %v845_v10 = vadd.f32 %v906_v3, %v844_v9  ;;  %v1112_v11 = vpop.f32.mrb[41].mxu0 }
 0x657   :  { %v847_v12 = vpop.f32.mrb[42].mxu0 }
 0x658   :  { %850 = vst.msk [vmem:[#allocation2] sm:$0xff] %vm423_vm1, %v845_v10  ;;  %v1113_v13 = vpop.f32.mrb[43].mxu0 }
 0x659   :  { %1151 = shalt.err (!%p1148_p4)
}
 0x65a   :  { %s1152_s4 = scalar_lea.hbm %s1363_s5, 128 }
 0x65b   :  { %p1153_p5 = scmp.ne.s32.totalorder %s1363_s5, %s1152_s4  ;;  %p1156_p6 = scmp.lt.u32.totalorder %s1152_s4, %s1363_s5 }
 0x65d   :  { %p1158_p7 = pnand %p1156_p6, %p1153_p5 }
 0x65f   :  { %1161 = shalt.err (!%p1158_p7)
}
 0x660   :  { %860 = dma.vmem_to_hbm [thread:$0]  %s858_s3, 128, %s1363_s5, [#allocation3]  }
 0x661   :  { %1162 = dma.done.wait [#allocation3], 128  }
 0x662   :  { %1163 = vsyncadd [#allocation3], 4294967168 }
 0x663   :  { %864 = vsyncpa [#allocation3], 1 }

</bundles_post_ra>
